<compile_context>
chip_gen: v5e
topology: v5e:2x2
jax: 0.10.0
libtpu: 0.0.40
codegen_flags: <defaults>
</compile_context>

<pallas_src>
import functools

import jax
import jax.numpy as jnp
from jax import lax
from jax.experimental import pallas as pl
from jax.experimental.pallas import tpu as pltpu

_MIB = 1024 * 1024
# f32 working-set multiplier inside the kernel (f32 copy of x + diff + square,
# stats tensors are lower order).  Conservative; used only for block sizing.
_TEMP_MULT = 3


def _round_up(v, m):
    return (v + m - 1) // m * m


def _hw_config():
    """Generation-gated sizing.  v7x: 64 MiB VMEM / 2 TensorCores; v5e/v6e:
    128 MiB VMEM / 1 TensorCore.  Falls back to the conservative v7x-class
    numbers if the hardware query is unavailable."""
    vmem_cap = 64 * _MIB
    try:
        vmem_cap = int(pltpu.get_tpu_info().vmem_capacity_bytes)
    except Exception:
        pass
    if vmem_cap <= 64 * _MIB:
        # v7x-class: small VMEM, 2 TCs -> balance the grid across cores.
        return {"vmem_limit": 48 * _MIB, "budget": 40 * _MIB, "two_cores": True}
    # v5e / v6e class: big VMEM, single TC -> just maximize block size.
    return {"vmem_limit": 96 * _MIB, "budget": 80 * _MIB, "two_cores": False}


def _choose_block(n_slabs, per_slab_bytes, budget_bytes, two_cores):
    """Pick slabs-per-block (nslab) and a possibly padded slab count.

    Maximizes block size within the VMEM budget.  On 2-TC chips prefer an even
    number of grid steps (load balance for dimension_semantics='parallel');
    if no good divisor of n_slabs exists, pad the slab axis instead of
    degrading to tiny blocks."""
    cap = max(1, budget_bytes // max(per_slab_bytes, 1))
    cap = int(min(cap, n_slabs))

    def steps_ok(steps):
        if not two_cores or n_slabs < 2:
            return True
        return steps >= 2 and steps % 2 == 0

    best_div = 0
    for d in range(cap, 0, -1):
        if n_slabs % d == 0 and steps_ok(n_slabs // d):
            best_div = d
            break
    if best_div * 2 >= cap:          # close enough to the cap -> no padding
        return best_div, n_slabs

    # Pad the slab axis: choose a step count, then block size, then extent.
    steps = -(-n_slabs // cap)
    if two_cores and steps % 2:
        steps += 1
    nslab = -(-n_slabs // steps)
    return nslab, steps * nslab


def _group_norm_kernel(x_ref, gamma_ref, beta_ref, o_ref, *, eps, height, width):
    # Per grid step:
    #   x_ref, o_ref:        (nslab, Cg, H*W)   lane-dense (H*W on lanes)
    #   gamma_ref, beta_ref: (nslab, Cg, 1)     per-slab affine rows (f32)
    nslab = x_ref.shape[0]
    cg = x_ref.shape[1]

    # ---- statistics (f32), per slab ---------------------------------------
    x = x_ref[...].astype(jnp.float32)
    mc = jnp.mean(x, axis=1, keepdims=True)                      # (ns, 1, HW)
    mean = jnp.mean(mc, axis=2, keepdims=True)                   # (ns, 1, 1)
    d1 = x - mc                                                  # two-pass: no cancellation
    v1 = jnp.sum(d1 * d1, axis=1, keepdims=True) * (1.0 / (cg - 1))   # (ns, 1, HW)

    # v1 is tiny (~KiB per slab): one relayout to (ns, H, W) is cheaper and
    # flatter in H than unrolled sub-128-lane slicing.
    v1 = v1.reshape(nslab, height, width)
    m2 = jnp.mean(v1, axis=1, keepdims=True)                     # (ns, 1, W)
    d2 = v1 - m2
    v2 = jnp.sum(d2 * d2, axis=1, keepdims=True) * (1.0 / (height - 1))
    m3 = jnp.mean(v2, axis=2, keepdims=True)                     # (ns, 1, 1)
    d3 = v2 - m3
    v3 = jnp.sum(d3 * d3, axis=2, keepdims=True) * (1.0 / (width - 1))
    inv = lax.rsqrt(v3 + eps)                                    # EUP, (ns, 1, 1)

    # ---- fused affine tail:  y = x*scale + shift ----------------------------
    scale = gamma_ref[...] * inv                                 # (ns, Cg, 1) f32
    shift = beta_ref[...] - mean * scale                         # (ns, Cg, 1) f32

    # Re-read x_ref (don't keep the stats-phase f32 copy live) so Mosaic can
    # reuse that VMEM scratch for the tail temporaries.
    if jnp.dtype(o_ref.dtype) == jnp.dtype(jnp.bfloat16):
        # bf16 VALU tail (v6e/v7x): halves block-sized temporary pressure.
        o_ref[...] = x_ref[...] * scale.astype(jnp.bfloat16) + shift.astype(jnp.bfloat16)
    else:
        o_ref[...] = (x_ref[...].astype(jnp.float32) * scale + shift).astype(o_ref.dtype)


def group_norm_2d(x, gamma, beta, groups, eps=1e-5):
    """x: (B, C, H, W); gamma, beta: (C,) applied per-channel (as (1,C,1,1))."""
    B, C, H, W = x.shape
    assert C % groups == 0, "channels must divide evenly into groups"
    Cg = C // groups
    # torch.var uses the unbiased (n-1) divisor at every stage -> need n >= 2.
    assert Cg >= 2 and H >= 2 and W >= 2, "unbiased var needs >=2 elems per reduced dim"

    HW = H * W
    n_slabs = B * groups

    # Lane-dense layout: last (lane) dim is H*W.  (If HW % 128 != 0 the kernel
    # is still correct, just loses the unmasked-store guarantee.)
    x_g = x.reshape(n_slabs, Cg, HW)

    # Per-slab affine rows; slab index = b*groups + g, params depend only on g.
    # NOTE: materializing B copies is ~1/(H*W) of the x traffic -> negligible
    # for this HBM-bound kernel, and keeps each per-step gamma/beta BlockSpec a
    # dense (nslab, Cg, 1) DMA with no in-kernel indexing.
    gamma_s = jnp.broadcast_to(
        gamma.astype(jnp.float32).reshape(1, groups, Cg), (B, groups, Cg)
    ).reshape(n_slabs, Cg, 1)
    beta_s = jnp.broadcast_to(
        beta.astype(jnp.float32).reshape(1, groups, Cg), (B, groups, Cg)
    ).reshape(n_slabs, Cg, 1)

    # ---- generation-gated block sizing --------------------------------------
    cfg = _hw_config()
    pe = _round_up(Cg, 8) * _round_up(HW, 128)       # padded elems per x slab
    param_pe = _round_up(Cg, 8) * 128                # padded elems per param row
    per_slab_bytes = (
        2 * 2 * pe * x.dtype.itemsize                # double-buffered x in + out
        + _TEMP_MULT * 4 * pe                        # f32 working set in kernel
        + 2 * 2 * param_pe * 4                       # double-buffered gamma/beta
    )
    nslab, n_slabs_pad = _choose_block(
        n_slabs, per_slab_bytes, cfg["budget"], cfg["two_cores"]
    )
    if n_slabs_pad != n_slabs:
        pad = n_slabs_pad - n_slabs
        x_g = jnp.pad(x_g, ((0, pad), (0, 0), (0, 0)))
        gamma_s = jnp.pad(gamma_s, ((0, pad), (0, 0), (0, 0)), constant_values=1.0)
        beta_s = jnp.pad(beta_s, ((0, pad), (0, 0), (0, 0)))
    n_steps = n_slabs_pad // nslab

    kernel = functools.partial(_group_norm_kernel, eps=eps, height=H, width=W)

    cost = pl.CostEstimate(
        flops=10 * int(x_g.size),                    # a few VPU ops / element
        transcendentals=int(n_slabs_pad),            # one rsqrt per slab
        bytes_accessed=2 * int(x_g.size) * x.dtype.itemsize
        + int(gamma_s.size + beta_s.size) * 4,
    )

    out = pl.pallas_call(
        kernel,
        out_shape=jax.ShapeDtypeStruct((n_slabs_pad, Cg, HW), x.dtype),
        grid_spec=pltpu.PrefetchScalarGridSpec(
            num_scalar_prefetch=0,
            grid=(n_steps,),
            in_specs=[
                pl.BlockSpec((nslab, Cg, HW), lambda i: (i, 0, 0)),
                pl.BlockSpec((nslab, Cg, 1), lambda i: (i, 0, 0)),
                pl.BlockSpec((nslab, Cg, 1), lambda i: (i, 0, 0)),
            ],
            out_specs=pl.BlockSpec((nslab, Cg, HW), lambda i: (i, 0, 0)),
        ),
        compiler_params=pltpu.CompilerParams(
            dimension_semantics=("parallel",),
            vmem_limit_bytes=cfg["vmem_limit"],
        ),
        cost_estimate=cost,
    )(x_g, gamma_s, beta_s)

    if n_slabs_pad != n_slabs:
        out = out[:n_slabs]
    return out.reshape(B, C, H, W)


# ------------------------------ validation --------------------------------
def _unbiased_var(a, axis):
    """torch.var default: unbiased (divide by n-1), keepdim=True."""
    n = a.shape[axis]
    m = jnp.mean(a, axis=axis, keepdims=True)
    return jnp.sum((a - m) ** 2, axis=axis, keepdims=True) / (n - 1)


def _reference(x, gamma, beta, groups, eps=1e-5):
    """Pure-JAX mirror of the (quirky) PyTorch forward."""
    B, C, H, W = x.shape
    Cg = C // groups
    xr = x.reshape(B, groups, Cg, H, W)
    mean = jnp.mean(xr, axis=(2, 3, 4), keepdims=True)
    v = _unbiased_var(_unbiased_var(_unbiased_var(xr, 2), 3), 4)
    xn = (xr - mean) / jnp.sqrt(v + eps)
    xn = xn.reshape(B, C, H, W)
    return xn * gamma.reshape(1, C, 1, 1) + beta.reshape(1, C, 1, 1)


if __name__ == "__main__":
    B, C, H, W = 2, 4, 16, 16
    groups = 2
    eps = 1e-5

    key = jax.random.PRNGKey(0)
    x = jax.random.normal(key, (B, C, H, W), dtype=jnp.float32)

    # Deterministic synthetic parameters (no checkpoint).
    gamma = jnp.linspace(0.5, 1.5, C, dtype=jnp.float32)
    beta = jnp.linspace(-0.2, 0.2, C, dtype=jnp.float32)

    out = group_norm_2d(x, gamma, beta, groups, eps)
    out = jax.block_until_ready(out)

    ref = _reference(x, gamma, beta, groups, eps)
    assert out.shape == (B, C, H, W)
    assert jnp.allclose(out, ref, atol=1e-5, rtol=1e-5), "mismatch vs reference"

    print("KERNEL_OK")
</pallas_src>

<mosaic_0001>
module attributes {stable_mosaic.version = 11 : i64} {
  func.func @_group_norm_kernel(%arg0: i32, %arg1: memref<2x2x256xf32, #tpu.memory_space<vmem>>, %arg2: memref<2x2x1xf32, #tpu.memory_space<vmem>>, %arg3: memref<2x2x1xf32, #tpu.memory_space<vmem>>, %arg4: memref<2x2x256xf32, #tpu.memory_space<vmem>>) attributes {dimension_semantics = [#tpu.dimension_semantics<parallel>], iteration_bounds = array<i64: 2>, scalar_prefetch = 0 : i64, scratch_operands = 0 : i64, tpu.core_type = #tpu.core_type<tc>, window_params = [{transform_indices = @transform_0, window_bounds = array<i64: 2, 2, 256>}, {transform_indices = @transform_1, window_bounds = array<i64: 2, 2, 1>}, {transform_indices = @transform_2, window_bounds = array<i64: 2, 2, 1>}, {transform_indices = @transform_3, window_bounds = array<i64: 2, 2, 256>}]} {
    %c0 = arith.constant 0 : index
    %c0_0 = arith.constant 0 : index
    %c0_1 = arith.constant 0 : index
    %0 = vector.load %arg1[%c0, %c0_0, %c0_1] : memref<2x2x256xf32, #tpu.memory_space<vmem>>, vector<2x2x256xf32>
    %cst = arith.constant dense<0.000000e+00> : vector<2x256xf32>
    %1 = vector.multi_reduction <add>, %0, %cst [1] : vector<2x2x256xf32> to vector<2x256xf32>
    %2 = vector.shape_cast %1 : vector<2x256xf32> to vector<2x1x256xf32>
    %cst_2 = arith.constant 2.000000e+00 : f32
    %3 = vector.broadcast %cst_2 : f32 to vector<2x1x256xf32>
    %4 = arith.divf %2, %3 : vector<2x1x256xf32>
    %cst_3 = arith.constant dense<0.000000e+00> : vector<2x1xf32>
    %5 = vector.multi_reduction <add>, %4, %cst_3 [2] : vector<2x1x256xf32> to vector<2x1xf32>
    %6 = vector.shape_cast %5 : vector<2x1xf32> to vector<2x1x1xf32>
    %cst_4 = arith.constant 2.560000e+02 : f32
    %7 = vector.broadcast %cst_4 : f32 to vector<2x1x1xf32>
    %8 = arith.divf %6, %7 : vector<2x1x1xf32>
    %9 = vector.broadcast %4 : vector<2x1x256xf32> to vector<2x2x256xf32>
    %10 = arith.subf %0, %9 : vector<2x2x256xf32>
    %11 = arith.mulf %10, %10 : vector<2x2x256xf32>
    %cst_5 = arith.constant dense<0.000000e+00> : vector<2x256xf32>
    %12 = vector.multi_reduction <add>, %11, %cst_5 [1] : vector<2x2x256xf32> to vector<2x256xf32>
    %13 = vector.shape_cast %12 : vector<2x256xf32> to vector<2x1x256xf32>
    %cst_6 = arith.constant 1.000000e+00 : f32
    %14 = vector.broadcast %cst_6 : f32 to vector<2x1x256xf32>
    %15 = arith.mulf %13, %14 : vector<2x1x256xf32>
    %16 = vector.shape_cast %15 : vector<2x1x256xf32> to vector<2x16x16xf32>
    %cst_7 = arith.constant dense<0.000000e+00> : vector<2x16xf32>
    %17 = vector.multi_reduction <add>, %16, %cst_7 [1] : vector<2x16x16xf32> to vector<2x16xf32>
    %18 = vector.shape_cast %17 : vector<2x16xf32> to vector<2x1x16xf32>
    %cst_8 = arith.constant 1.600000e+01 : f32
    %19 = vector.broadcast %cst_8 : f32 to vector<2x1x16xf32>
    %20 = arith.divf %18, %19 : vector<2x1x16xf32>
    %21 = vector.broadcast %20 : vector<2x1x16xf32> to vector<2x16x16xf32>
    %22 = arith.subf %16, %21 : vector<2x16x16xf32>
    %23 = arith.mulf %22, %22 : vector<2x16x16xf32>
    %cst_9 = arith.constant dense<0.000000e+00> : vector<2x16xf32>
    %24 = vector.multi_reduction <add>, %23, %cst_9 [1] : vector<2x16x16xf32> to vector<2x16xf32>
    %25 = vector.shape_cast %24 : vector<2x16xf32> to vector<2x1x16xf32>
    %cst_10 = arith.constant 0.0666666701 : f32
    %26 = vector.broadcast %cst_10 : f32 to vector<2x1x16xf32>
    %27 = arith.mulf %25, %26 : vector<2x1x16xf32>
    %cst_11 = arith.constant dense<0.000000e+00> : vector<2x1xf32>
    %28 = vector.multi_reduction <add>, %27, %cst_11 [2] : vector<2x1x16xf32> to vector<2x1xf32>
    %29 = vector.shape_cast %28 : vector<2x1xf32> to vector<2x1x1xf32>
    %cst_12 = arith.constant 1.600000e+01 : f32
    %30 = vector.broadcast %cst_12 : f32 to vector<2x1x1xf32>
    %31 = arith.divf %29, %30 : vector<2x1x1xf32>
    %32 = vector.broadcast %31 : vector<2x1x1xf32> to vector<2x1x16xf32>
    %33 = arith.subf %27, %32 : vector<2x1x16xf32>
    %34 = arith.mulf %33, %33 : vector<2x1x16xf32>
    %cst_13 = arith.constant dense<0.000000e+00> : vector<2x1xf32>
    %35 = vector.multi_reduction <add>, %34, %cst_13 [2] : vector<2x1x16xf32> to vector<2x1xf32>
    %36 = vector.shape_cast %35 : vector<2x1xf32> to vector<2x1x1xf32>
    %cst_14 = arith.constant 0.0666666701 : f32
    %37 = vector.broadcast %cst_14 : f32 to vector<2x1x1xf32>
    %38 = arith.mulf %36, %37 : vector<2x1x1xf32>
    %cst_15 = arith.constant 9.99999974E-6 : f32
    %39 = vector.broadcast %cst_15 : f32 to vector<2x1x1xf32>
    %40 = arith.addf %38, %39 : vector<2x1x1xf32>
    %41 = math.rsqrt %40 : vector<2x1x1xf32>
    %c0_16 = arith.constant 0 : index
    %c0_17 = arith.constant 0 : index
    %c0_18 = arith.constant 0 : index
    %42 = vector.load %arg2[%c0_16, %c0_17, %c0_18] : memref<2x2x1xf32, #tpu.memory_space<vmem>>, vector<2x2x1xf32>
    %43 = vector.broadcast %41 : vector<2x1x1xf32> to vector<2x2x1xf32>
    %44 = arith.mulf %42, %43 : vector<2x2x1xf32>
    %c0_19 = arith.constant 0 : index
    %c0_20 = arith.constant 0 : index
    %c0_21 = arith.constant 0 : index
    %45 = vector.load %arg3[%c0_19, %c0_20, %c0_21] : memref<2x2x1xf32, #tpu.memory_space<vmem>>, vector<2x2x1xf32>
    %46 = vector.broadcast %8 : vector<2x1x1xf32> to vector<2x2x1xf32>
    %47 = arith.mulf %46, %44 : vector<2x2x1xf32>
    %48 = arith.subf %45, %47 : vector<2x2x1xf32>
    %c0_22 = arith.constant 0 : index
    %c0_23 = arith.constant 0 : index
    %c0_24 = arith.constant 0 : index
    %49 = vector.load %arg1[%c0_22, %c0_23, %c0_24] : memref<2x2x256xf32, #tpu.memory_space<vmem>>, vector<2x2x256xf32>
    %50 = vector.broadcast %44 : vector<2x2x1xf32> to vector<2x2x256xf32>
    %51 = arith.mulf %49, %50 : vector<2x2x256xf32>
    %52 = vector.broadcast %48 : vector<2x2x1xf32> to vector<2x2x256xf32>
    %53 = arith.addf %51, %52 : vector<2x2x256xf32>
    %c0_25 = arith.constant 0 : index
    %c0_26 = arith.constant 0 : index
    %c0_27 = arith.constant 0 : index
    %54 = vector.load %arg4[%c0_25, %c0_26, %c0_27] : memref<2x2x256xf32, #tpu.memory_space<vmem>>, vector<2x2x256xf32>
    tpu.vector_store %arg4[%c0_25, %c0_26, %c0_27], %53 {strides = array<i32>} : memref<2x2x256xf32, #tpu.memory_space<vmem>>, vector<2x2x256xf32>,
    return
  }
  func.func @transform_0(%arg0: i32) -> (i32, i32, i32) {
    %c0_i32 = arith.constant 0 : i32
    %c0_i32_0 = arith.constant 0 : i32
    %c0_i32_1 = arith.constant 0 : i32
    return %arg0, %c0_i32, %c0_i32_0 : i32, i32, i32
  }
  func.func @transform_1(%arg0: i32) -> (i32, i32, i32) {
    %c0_i32 = arith.constant 0 : i32
    %c0_i32_0 = arith.constant 0 : i32
    %c0_i32_1 = arith.constant 0 : i32
    return %arg0, %c0_i32, %c0_i32_0 : i32, i32, i32
  }
  func.func @transform_2(%arg0: i32) -> (i32, i32, i32) {
    %c0_i32 = arith.constant 0 : i32
    %c0_i32_0 = arith.constant 0 : i32
    %c0_i32_1 = arith.constant 0 : i32
    return %arg0, %c0_i32, %c0_i32_0 : i32, i32, i32
  }
  func.func @transform_3(%arg0: i32) -> (i32, i32, i32) {
    %c0_i32 = arith.constant 0 : i32
    %c0_i32_0 = arith.constant 0 : i32
    %c0_i32_1 = arith.constant 0 : i32
    return %arg0, %c0_i32, %c0_i32_0 : i32, i32, i32
  }
}

</mosaic_0001>

<bundles_post_ra>
// kernel: tpu_custom_call.1
= control target key start
LH: loop header
LB: loop body
LE: loop exit
PB: predicated region body
PF: predicated region fallthrough
CT: control target
= control target key end

     0   :  { %8 = vsyncpa [#allocation3], 0  ;;  %s1218_s0 = inlined_call_operand.vmem [shape: f32[4,2,256], index: 0, kind: input, shape index: {}]   ;;  %s1219_s1 = inlined_call_operand.vmem [shape: f32[4,2,1], index: 1, kind: input, shape index: {}]   ;;  %s1220_s2 = inlined_call_operand.vmem [shape: f32[4,2,1], index: 2, kind: input, shape index: {}]   ;;  %s1221_s3 = inlined_call_operand.hbm [shape: f32[4,2,256], index: 3, kind: output, shape index: {}]  }
   0x1   :  { %10 = vsyncpa [#allocation3 + $0x1], 0  ;;  %s974_s12 = smov 0   ;;  %s976_s13 = smov 0  }
   0x2   :  { %s978_s14 = smov 0   ;;  %s980_s15 = smov 0  }
   0x3 LB: > { %s995_s16 = sadd.s32 4294967295, %s937_s15   ;;  %s787_s17 = sadd.s32 4294967294, %s937_s15   ;;  %s937_s15 = sphi %s980_s15, %s1227_s15   ;;  %s933_s14 = sphi %s978_s14, %s1226_s14   ;;  %s929_s13 = sphi %s976_s13, %s1225_s13   ;;  %s925_s12 = sphi %s974_s12, %s1224_s12  }
   0x4   : > { %s999_s18 = sadd.s32 1, %s937_s15   ;;  %s101_s19 = sadd.s32 1, %s933_s14 }
   0x5   : > { %s98_s20 = ssub.s32 %s937_s15, %s999_s18  ;;  %p111_p0 = scmp.ne.s32.totalorder %s933_s14, %s929_s13 }
   0x6   : > { %p99_p1 = scmp.eq.s32.totalorder %s98_s20, 0  ;;  %p112_p2 = scmp.eq.s32.totalorder %s995_s16, 1 }
   0x7   : > { %p117_p3 = scmp.ne.s32.totalorder %s929_s13, %s925_s12  ;;  %p118_p4 = scmp.eq.s32.totalorder %s787_s17, 1 }
   0x8   : > { %s1010_s21 = scalar_select %p99_p1, %s933_s14, %s101_s19  }
   0x9   : > { %p1012_p5 = por %p112_p2, %p111_p0  ;;  %p1016_p6 = por %p118_p4, %p117_p3 }
   0xa   : > { %p790_p7 = scmp.ge.s32.totalorder %s937_s15, 1  ;;  %p164_p8 = scmp.lt.s32.totalorder %s937_s15, 3 }
   0xc   : > { %p165_p9 = pnand %p790_p7, %p164_p8 }
   0xd   : > { %s792_s24 = sshll.u32 (!%p165_p9), %s995_s16, 1  ;;  %s940_s29 = smov (!%p165_p9), 80  }
   0xe   : > { %168 = sbr.rel (%p165_p9) target bundleno = 702 (0x2be), region = 32  ;;  %p200_p10 = scmp.lt.s32.totalorder (!%p165_p9), %s792_s24, 3 }
   0xf   : > { %s941_s30 = smov (!%p165_p9), 112   ;;  %s942_s4 = smov (!%p165_p9), 16  }
  0x10   : > { %s943_s5 = smov (!%p165_p9), 96   ;;  %s944_s6 = smov (!%p165_p9), 48  }
  0x11   : > { %s945_s7 = smov (!%p165_p9), 32   ;;  %s946_s8 = smov (!%p165_p9), 64  }
  0x12   : > { %s196_s26 = sand.u32 (!%p165_p9), 1, %s929_s13  }
  0x13   : > { %v939_v0 = vmov 2.0   ;;  %s1229_s24 = smov (!%p200_p10, %s792_s24), 3  ;;  %vm234_vm0 = vcmask 1041408   ;;  %vm405_vm2 = vcmask 1041409   ;;  %vm454_vm3 = vcmask 1047556   ;;  %s791_s27 = sshll.u32 %s196_s26, 3 }
  0x14   : > { %865 = vrcp.f32 %v939_v0  ;;  %s805_s25 = sshll.u32 %s1229_s24, 2  ;;  %vm534_vm4 = vcmask 130048   ;;  %s796_s9 = sshll.u32 %s1229_s24, 1 }
  0x15   : > { %s204_s28 = scalar_lea.vmem %s1218_s0, %s805_s25  ;;  %s210_s17 = scalar_lea.vmem %s1219_s1, %s796_s9 }
  0x16   : > { %v1029_v2 = vld [vmem:[%s204_s28 + $0x4] sm:$0xf]  ;;  %v1031_v3 = vld [vmem:[%s204_s28] sm:$0xf]  ;;  %s216_s25 = scalar_lea.vmem %s1220_s2, %s796_s9  ;;  %s807_s24 = sshll.u32 %s995_s16, 3 }
  0x17   : > { %227 = vst [vmem:[#allocation1 + $0x20] ss:$4 sm:$0xff] %v1029_v2  ;;  %s685_s16 = scalar_lea.sflag [#allocation3], %s196_s26 }
  0x18   : > { %223 = vst [vmem:[#allocation1] ss:$4 sm:$0xff] %v1031_v3 }
  0x1a   : > { %v866_v1 = vpop.eup %865 }
  0x1b   : > { %v264_v4 = vmul.f32 2.0, %v866_v1  ;;  %vm268_vm1 = vweird.f32 %v866_v1 }
  0x1d   : > { %v265_v5 = vsub.f32 1.0, %v264_v4 }
  0x1e   : > { %v228_v6 = vld.sshfl [vmem:[#allocation1 + $0x20] sm:$0xff pattern:$0x73625140]  ;;  %v229_v7 = vld.sshfl [vmem:[#allocation1 + $0x28] sm:$0xff pattern:$0x73625140] }
  0x1f   : > { %v249_v8 = vsel %vm234_vm0, %v228_v6, 0.0  ;;  %v256_v9 = vsel %vm234_vm0, %v229_v7, 0.0  ;;  %v224_v10 = vld.sshfl [vmem:[#allocation1] sm:$0xff pattern:$0x73625140]  ;;  %v266_v15 = vmul.f32 %v866_v1, %v265_v5 }
  0x20   : > { %v250_v11 = vrot.slane %v249_v8, 4  ;;  %v257_v12 = vrot.slane %v256_v9, 4  ;;  %v225_v13 = vld.sshfl [vmem:[#allocation1 + $0x8] sm:$0xff pattern:$0x73625140]  ;;  %v235_v14 = vsel %vm234_vm0, %v224_v10, 0.0 }
  0x21   : > { %v236_v16 = vrot.slane %v235_v14, 4  ;;  %v242_v17 = vsel %vm234_vm0, %v225_v13, 0.0  ;;  %v267_v25 = vadd.f32 %v866_v1, %v266_v15 }
  0x22   : > { %v251_v18 = vadd.f32 %v250_v11, %v249_v8  ;;  %v258_v19 = vadd.f32 %v257_v12, %v256_v9  ;;  %v243_v20 = vrot.slane %v242_v17, 4 }
  0x23   : > { %v237_v21 = vadd.f32 %v236_v16, %v235_v14  ;;  %v269_v34 = vsel %vm268_vm1, %v866_v1, %v267_v25 }
  0x24   : > { %v252_v22 = vrot.slane %v251_v18, 2  ;;  %v259_v23 = vrot.slane %v258_v19, 2  ;;  %v244_v24 = vadd.f32 %v243_v20, %v242_v17 }
  0x25   : > { %v238_v26 = vrot.slane %v237_v21, 2 }
  0x26   : > { %v253_v27 = vadd.f32 %v252_v22, %v251_v18  ;;  %v260_v28 = vadd.f32 %v259_v23, %v258_v19  ;;  %v245_v29 = vrot.slane %v244_v24, 2 }
  0x27   : > { %v239_v30 = vadd.f32 %v238_v26, %v237_v21 }
  0x28   : > { %v254_v31 = vrot.slane %v253_v27, 1  ;;  %v261_v32 = vrot.slane %v260_v28, 1  ;;  %v246_v33 = vadd.f32 %v245_v29, %v244_v24 }
  0x29   : > { %v240_v35 = vrot.slane %v239_v30, 1 }
  0x2a   : > { %v255_v36 = vadd.f32 %v254_v31, %v253_v27  ;;  %v262_v37 = vadd.f32 %v261_v32, %v260_v28  ;;  %v247_v38 = vrot.slane %v246_v33, 1 }
  0x2b   : > { %v241_v39 = vadd.f32 %v240_v35, %v239_v30 }
  0x2c   : > { %v1039_v40 = vmul.f32 %v269_v34, %v255_v36  ;;  %v1041_v41 = vmul.f32 %v269_v34, %v262_v37  ;;  %v248_v42 = vadd.f32 %v247_v38, %v246_v33 }
  0x2d   : > { %v1044_v44 = vmul.f32 %v269_v34, %v241_v39 }
  0x2e   : > { %v294_v43 = vrot.slane %v1041_v41, 6  ;;  %v1046_v45 = vmul.f32 %v269_v34, %v248_v42 }
  0x30   : > { %v296_v46 = vsel %vm234_vm0, %v1039_v40, %v294_v43  ;;  %v293_v47 = vrot.slane %v1046_v45, 6 }
  0x31   : > { %v300_v48 = vsub.f32 %v1029_v2, %v296_v46 }
  0x32   : > { %v295_v49 = vsel %vm234_vm0, %v1044_v44, %v293_v47 }
  0x33   : > { %v302_v50 = vmul.f32 %v300_v48, %v300_v48  ;;  %v299_v51 = vsub.f32 %v1031_v3, %v295_v49 }
  0x35   : > { %309 = vst [vmem:[#allocation1 + $0x20] ss:$4 sm:$0xff] %v302_v50  ;;  %v301_v52 = vmul.f32 %v299_v51, %v299_v51 }
  0x37   : > { %305 = vst [vmem:[#allocation1] ss:$4 sm:$0xff] %v301_v52 }
  0x3c   : > { %v311_v53 = vld.sshfl [vmem:[#allocation1 + $0x28] sm:$0xff pattern:$0x73625140]  ;;  %v310_v54 = vld.sshfl [vmem:[#allocation1 + $0x20] sm:$0xff pattern:$0x73625140] }
  0x3d   : > { %v337_v55 = vsel %vm234_vm0, %v311_v53, 0.0  ;;  %v330_v56 = vsel %vm234_vm0, %v310_v54, 0.0 }
  0x3e   : > { %v338_v57 = vrot.slane %v337_v55, 4  ;;  %v331_v58 = vrot.slane %v330_v56, 4  ;;  %v306_v59 = vld.sshfl [vmem:[#allocation1] sm:$0xff pattern:$0x73625140] }
  0x3f   : > { %v316_v60 = vsel %vm234_vm0, %v306_v59, 0.0  ;;  %v307_v12 = vld.sshfl [vmem:[#allocation1 + $0x8] sm:$0xff pattern:$0x73625140] }
  0x40   : > { %v339_v61 = vadd.f32 %v338_v57, %v337_v55  ;;  %v332_v62 = vadd.f32 %v331_v58, %v330_v56  ;;  %v317_v1 = vrot.slane %v316_v60, 4  ;;  %v323_v14 = vsel %vm234_vm0, %v307_v12, 0.0 }
  0x41   : > { %v324_v16 = vrot.slane %v323_v14, 4 }
  0x42   : > { %v340_v63 = vrot.slane %v339_v61, 2  ;;  %v333_v0 = vrot.slane %v332_v62, 2  ;;  %v318_v8 = vadd.f32 %v317_v1, %v316_v60 }
  0x43   : > { %v325_v18 = vadd.f32 %v324_v16, %v323_v14 }
  0x44   : > { %v341_v4 = vadd.f32 %v340_v63, %v339_v61  ;;  %v334_v5 = vadd.f32 %v333_v0, %v332_v62  ;;  %v319_v11 = vrot.slane %v318_v8, 2  ;;  %v947_v61 = vmov 1983009808  }
  0x45   : > { %v326_v19 = vrot.slane %v325_v18, 2  ;;  %v457_v62 = vunpack.c.l.s4 %v947_v61 }
  0x46   : > { %v342_v6 = vrot.slane %v341_v4, 1  ;;  %v335_v7 = vrot.slane %v334_v5, 1  ;;  %v320_v13 = vadd.f32 %v319_v11, %v318_v8 }
  0x47   : > { %v327_v20 = vadd.f32 %v326_v19, %v325_v18  ;;  %v458_v18 = vunpack.c.0.s8 %v457_v62 }
  0x48   : > { %v1058_v9 = vadd.f32 %v342_v6, %v341_v4  ;;  %v1060_v10 = vadd.f32 %v335_v7, %v334_v5  ;;  %v321_v15 = vrot.slane %v320_v13, 1 }
  0x49   : > { %v328_v21 = vrot.slane %v327_v20, 1 }
  0x4a   : > { %386 = vrot.lane.b32.xlu1 %v1058_v9, %s940_s29  ;;  %356 = vrot.lane.b32.xlu0 %v1060_v10, %s940_s29  ;;  %v1072_v17 = vadd.f32 %v321_v15, %v320_v13  ;;  %v404_v54 = vrot.slane %v1060_v10, 7 }
  0x4b   : > { %348 = vrot.lane.b32.xlu2 %v1060_v10, %s941_s30  ;;  %v1082_v22 = vadd.f32 %v328_v21, %v327_v20 }
  0x4c   : > { %v406_v21 = vsel %vm405_vm2, %v404_v54, %v1072_v17 }
  0x52   : > { %402 = vrot.lane.b32.xlu1 %v1058_v9, %s942_s4  ;;  %372 = vrot.lane.b32.xlu0 %v1060_v10, %s942_s4 }
  0x53   : > { %352 = vrot.lane.b32.xlu2 %v1060_v10, %s943_s5 }
  0x5a   : > { %364 = vrot.lane.b32.xlu1 %v1060_v10, %s944_s6  ;;  %354 = vrot.lane.b32.xlu0 %v1072_v17, %s940_s29 }
  0x5b   : > { %368 = vrot.lane.b32.xlu2 %v1060_v10, %s945_s7 }
  0x62   : > { %378 = vrot.lane.b32.xlu1 %v1058_v9, %s941_s30  ;;  %370 = vrot.lane.b32.xlu0 %v1072_v17, %s942_s4 }
  0x63   : > { %382 = vrot.lane.b32.xlu2 %v1058_v9, %s943_s5 }
  0x6a   : > { %394 = vrot.lane.b32.xlu1 %v1058_v9, %s944_s6  ;;  %384 = vrot.lane.b32.xlu0 %v1082_v22, %s940_s29 }
  0x6b   : > { %398 = vrot.lane.b32.xlu2 %v1058_v9, %s945_s7 }
  0x72   : > { %346 = vrot.lane.b32.xlu1 %v1072_v17, %s941_s30  ;;  %400 = vrot.lane.b32.xlu0 %v1082_v22, %s942_s4  ;;  %s198_s4 = scalar_lea.vmem [#allocation2], %s791_s27 }
  0x73   : > { %350 = vrot.lane.b32.xlu2 %v1072_v17, %s943_s5 }
  0x7a   : > { %362 = vrot.lane.b32.xlu1 %v1072_v17, %s944_s6  ;;  %360 = vrot.lane.b32.xlu0 %v1060_v10, %s946_s8  ;;  %v421_v10 = vrot.slane %v1058_v9, 7 }
  0x7b   : > { %366 = vrot.lane.b32.xlu2 %v1072_v17, %s945_s7 }
  0x82   : > { %380 = vrot.lane.b32.xlu1 %v1082_v22, %s943_s5  ;;  %376 = vrot.lane.b32.xlu0 %v1082_v22, %s941_s30  ;;  %s697_s30 = scalar_lea.hbm %s1221_s3, %s807_s24  ;;  %s698_s5 = sshll.u32 %s198_s4, 4  ;;  %s699_s5 = int_to_ptr.vmem [resolvable:$true] %s698_s5 }
  0x83   : > { %390 = vrot.lane.b32.xlu2 %v1058_v9, %s946_s8 }
  0x8a   : > { %396 = vrot.lane.b32.xlu1 %v1082_v22, %s945_s7  ;;  %392 = vrot.lane.b32.xlu0 %v1082_v22, %s944_s6  ;;  %s700_s6 = sshll.u32 %s697_s30, 4  ;;  %s701_s6 = int_to_ptr.hbm [resolvable:$true] %s700_s6 }
  0x8b   : > { %358 = vrot.lane.b32.xlu2 %v1072_v17, %s946_s8  ;;  %s889_s7 = sshra.s32 %s701_s6, 4  ;;  %s890_s7 = int_to_ptr.hbm [resolvable:$true] %s889_s7 }
  0x8c   : > { %s891_s9 = scalar_lea.hbm %s890_s7, 8  ;;  %p896_p0 = scmp.lt.s32.totalorder %s890_s7, %s1221_s3 }
  0x8d   : > { %p892_p11 = scmp.ne.s32.totalorder %s890_s7, %s891_s9 }
  0x8f   : > { %p893_p12 = pnand %p892_p11, %p1012_p5 }
  0x91   : > { %p894_p13 = pneg %p893_p12 }
  0x92   : > { %388 = vrot.lane.b32.xlu0 %v1082_v22, %s946_s8 }
  0xa5   : > { %v349_v23 = vpop.permute.xlu2 %348 }
  0xa6   : > { %v407_v52 = vrot.slane %v349_v23, 7 }
  0xad   : > { %v353_v24 = vpop.permute.xlu2 %352 }
  0xae   : > { %v409_v53 = vrot.slane %v353_v24, 7 }
  0xb5   : > { %v369_v25 = vpop.permute.xlu2 %368 }
  0xb6   : > { %v417_v55 = vrot.slane %v369_v25, 7 }
  0xbc   : > { %v387_v26 = vpop.permute.xlu1 %386  ;;  %v357_v27 = vpop.permute.xlu0 %356 }
  0xbd   : > { %v383_v28 = vpop.permute.xlu2 %382  ;;  %v411_v49 = vrot.slane %v357_v27, 7  ;;  %v427_v56 = vrot.slane %v387_v26, 7 }
  0xbe   : > { %v425_v59 = vrot.slane %v383_v28, 7 }
  0xc4   : > { %v1107_v29 = vpop.permute.xlu1 %402  ;;  %v373_v30 = vpop.permute.xlu0 %372 }
  0xc5   : > { %v1109_v33 = vpop.permute.xlu2 %398  ;;  %v419_v50 = vrot.slane %v373_v30, 7  ;;  %v435_v28 = vrot.slane %v1107_v29, 7 }
  0xcc   : > { %v365_v31 = vpop.permute.xlu1 %364  ;;  %v355_v32 = vpop.permute.xlu0 %354 }
  0xcd   : > { %v351_v36 = vpop.permute.xlu2 %350  ;;  %v412_v51 = vsel %vm405_vm2, %v411_v49, %v355_v32  ;;  %v415_v57 = vrot.slane %v365_v31, 7  ;;  %v422_v31 = vsel %vm405_vm2, %v421_v10, %v1082_v22 }
  0xce   : > { %v460_v60 = vrot.slane %v412_v51, 4  ;;  %v410_v7 = vsel %vm405_vm2, %v409_v53, %v351_v36 }
  0xcf   : > { %v453_v23 = vrot.slane %v410_v7, 4 }
  0xd1   : > { %v455_v36 = vsel %vm454_vm3, %v453_v23, %v406_v21 }
  0xd4   : > { %v379_v34 = vpop.permute.xlu1 %378  ;;  %v371_v35 = vpop.permute.xlu0 %370 }
  0xd5   : > { %v367_v39 = vpop.permute.xlu2 %366  ;;  %v420_v58 = vsel %vm405_vm2, %v419_v50, %v371_v35  ;;  %v423_v0 = vrot.slane %v379_v34, 7 }
  0xd6   : > { %v472_v8 = vrot.slane %v420_v58, 4  ;;  %v418_v13 = vsel %vm405_vm2, %v417_v55, %v367_v39 }
  0xd7   : > { %v466_v24 = vrot.slane %v418_v13, 4 }
  0xdc   : > { %v1111_v37 = vpop.permute.xlu1 %394  ;;  %v385_v38 = vpop.permute.xlu0 %384 }
  0xdd   : > { %v1113_v46 = vpop.permute.xlu2 %390  ;;  %v428_v1 = vsel %vm405_vm2, %v427_v56, %v385_v38  ;;  %v431_v34 = vrot.slane %v1111_v37, 7  ;;  %v948_v38 = vmov 1934713408   ;;  %v459_v37 = vperm.slane %v455_v36, %v458_v18 }
  0xde   : > { %v500_v19 = vrot.slane %v428_v1, 4  ;;  %v481_v39 = vunpack.c.l.s4 %v948_v38  ;;  %v949_v56 = vmov 16.0  }
  0xdf   : > { %867 = vrcp.f32 %v949_v56 }
  0xe0   : > { %v482_v54 = vunpack.c.0.s8 %v481_v39 }
  0xe4   : > { %v347_v42 = vpop.permute.xlu1 %346  ;;  %v401_v43 = vpop.permute.xlu0 %400 }
  0xe5   : > { %v408_v63 = vsel %vm405_vm2, %v407_v52, %v347_v42  ;;  %v359_v6 = vpop.permute.xlu2 %358  ;;  %v436_v17 = vsel %vm405_vm2, %v435_v28, %v401_v43  ;;  %v433_v52 = vrot.slane %v1109_v33, 7 }
  0xe6   : > { %v461_v14 = vsel %vm454_vm3, %v460_v60, %v408_v63  ;;  %v512_v22 = vrot.slane %v436_v17, 4  ;;  %v429_v60 = vrot.slane %v1113_v46, 7 }
  0xe7   : > { %v465_v25 = vperm.slane %v461_v14, %v458_v18 }
  0xe9   : > { %v478_v42 = vrot.slane %v465_v25, 4 }
  0xec   : > { %v363_v47 = vpop.permute.xlu1 %362  ;;  %v361_v48 = vpop.permute.xlu0 %360 }
  0xed   : > { %v416_v4 = vsel %vm405_vm2, %v415_v57, %v363_v47  ;;  %v413_v5 = vrot.slane %v361_v48, 7  ;;  %v479_v57 = vsel %vm454_vm3, %v478_v42, %v459_v37 }
  0xee   : > { %v473_v20 = vsel %vm454_vm3, %v472_v8, %v416_v4  ;;  %v483_v33 = vperm.slane %v479_v57, %v482_v54 }
  0xef   : > { %v414_v9 = vsel %vm405_vm2, %v413_v5, %v359_v6  ;;  %v477_v30 = vperm.slane %v473_v20, %v458_v18  ;;  %v868_v5 = vpop.eup %867 }
  0xf0   : > { %v467_v32 = vsel %vm454_vm3, %v466_v24, %v414_v9  ;;  %v554_v46 = vmul.f32 16.0, %v868_v5  ;;  %vm558_vm5 = vweird.f32 %v868_v5 }
  0xf1   : > { %v484_v29 = vrot.slane %v477_v30, 4  ;;  %v471_v49 = vperm.slane %v467_v32, %v458_v18 }
  0xf3   : > { %v485_v58 = vsel %vm454_vm3, %v484_v29, %v471_v49 }
  0xf4   : > { %v381_v11 = vpop.permute.xlu1 %380  ;;  %v377_v12 = vpop.permute.xlu0 %376  ;;  %v489_v63 = vperm.slane %v485_v58, %v482_v54 }
  0xf5   : > { %v426_v15 = vsel %vm405_vm2, %v425_v59, %v381_v11  ;;  %v424_v16 = vsel %vm405_vm2, %v423_v0, %v377_v12  ;;  %v492_v11 = vrot.slane %v483_v33, 4 }
  0xf6   : > { %v494_v26 = vrot.slane %v426_v15, 4  ;;  %v501_v27 = vsel %vm454_vm3, %v500_v19, %v424_v16  ;;  %v490_v12 = vrot.slane %v489_v63, 4 }
  0xf7   : > { %v505_v35 = vperm.slane %v501_v27, %v458_v18  ;;  %v493_v16 = vsel %vm454_vm3, %v489_v63, %v492_v11 }
  0xf8   : > { %v495_v47 = vsel %vm454_vm3, %v494_v26, %v422_v31  ;;  %v491_v21 = vsel %vm454_vm3, %v490_v12, %v483_v33  ;;  %v544_v23 = vsel %vm534_vm4, %v493_v16, 0.0 }
  0xf9   : > { %v499_v53 = vperm.slane %v495_v47, %v458_v18  ;;  %v518_v43 = vrot.slane %v505_v35, 4  ;;  %v535_v26 = vsel %vm534_vm4, %v491_v21, 0.0 }
  0xfb   : > { %v519_v61 = vsel %vm454_vm3, %v518_v43, %v499_v53 }
  0xfc   : > { %v393_v48 = vpop.permute.xlu0 %392  ;;  %v397_v51 = vpop.permute.xlu1 %396  ;;  %v523_v6 = vperm.slane %v519_v61, %v482_v54 }
  0xfd   : > { %v432_v50 = vsel %vm405_vm2, %v431_v34, %v393_v48  ;;  %v434_v59 = vsel %vm405_vm2, %v433_v52, %v397_v51 }
  0xfe   : > { %v513_v55 = vsel %vm454_vm3, %v512_v22, %v432_v50  ;;  %v506_v0 = vrot.slane %v434_v59, 4  ;;  %v532_v14 = vrot.slane %v523_v6, 4 }
  0xff   : > { %v517_v62 = vperm.slane %v513_v55, %v458_v18 }
 0x101   : > { %v524_v8 = vrot.slane %v517_v62, 4 }
 0x104   : > { %v389_v1 = vpop.permute.xlu0 %388 }
 0x105   : > { %v430_v4 = vsel %vm405_vm2, %v429_v60, %v389_v1 }
 0x106   : > { %v507_v7 = vsel %vm454_vm3, %v506_v0, %v430_v4 }
 0x107   : > { %v511_v10 = vperm.slane %v507_v7, %v458_v18  ;;  %v555_v18 = vsub.f32 1.0, %v554_v46 }
 0x109   : > { %v525_v13 = vsel %vm454_vm3, %v524_v8, %v511_v10  ;;  %v556_v31 = vmul.f32 %v868_v5, %v555_v18 }
 0x10a   : > { %v529_v15 = vperm.slane %v525_v13, %v482_v54 }
 0x10b   : > { %v557_v36 = vadd.f32 %v868_v5, %v556_v31 }
 0x10c   : > { %v530_v19 = vrot.slane %v529_v15, 4  ;;  %v533_v20 = vsel %vm454_vm3, %v529_v15, %v532_v14 }
 0x10d   : > { %v545_v9 = vsel %vm534_vm4, %v533_v20, 0.0  ;;  %v559_v48 = vsel %vm558_vm5, %v868_v5, %v557_v36 }
 0x10e   : > { %v546_v24 = vadd.f32 %v545_v9, %v544_v23  ;;  %v531_v25 = vsel %vm454_vm3, %v530_v19, %v523_v6  ;;  %v274_v19 = vadd.f32 %v1046_v45, %v1044_v44  ;;  %v950_v44 = vmov 0  }
 0x10f   : > { %v536_v27 = vsel %vm534_vm4, %v531_v25, 0.0  ;;  %863 = vset.pattern.permute.xlu1 %v950_v44  ;;  %862 = vset.pattern.permute.xlu0 %v950_v44  ;;  %v951_v45 = vmov 256.0  }
 0x110   : > { %v547_v28 = vrot.slane %v546_v24, 4  ;;  %v537_v30 = vadd.f32 %v536_v27, %v535_v26  ;;  %864 = vset.pattern.permute.xlu2 %v950_v44  ;;  %869 = vrcp.f32 %v951_v45 }
 0x112   : > { %v548_v32 = vadd.f32 %v547_v28, %v546_v24  ;;  %v538_v34 = vrot.slane %v537_v30, 4 }
 0x114   : > { %v549_v17 = vrot.slane %v548_v32, 2  ;;  %v539_v35 = vadd.f32 %v538_v34, %v537_v30  ;;  %v277_v30 = vadd.f32 %v1041_v41, %v1039_v40 }
 0x116   : > { %v550_v38 = vadd.f32 %v549_v17, %v548_v32  ;;  %v540_v39 = vrot.slane %v539_v35, 2  ;;  %v870_v31 = vpop.eup %869 }
 0x117   : > { %vm285_vm6 = vweird.f32 %v870_v31 }
 0x118   : > { %v551_v42 = vrot.slane %v550_v38, 1  ;;  %v541_v47 = vadd.f32 %v540_v39, %v539_v35 }
 0x11a   : > { %v552_v29 = vadd.f32 %v551_v42, %v550_v38  ;;  %v542_v49 = vrot.slane %v541_v47, 1  ;;  %v281_v38 = vmul.f32 256.0, %v870_v31 }
 0x11c   : > { %v561_v50 = vmul.f32 %v559_v48, %v552_v29  ;;  %v543_v22 = vadd.f32 %v542_v49, %v541_v47  ;;  %v282_v40 = vsub.f32 1.0, %v281_v38 }
 0x11e   : > { %v564_v51 = vsub.f32 %v493_v16, %v561_v50  ;;  %v565_v52 = vsub.f32 %v533_v20, %v561_v50  ;;  %v560_v37 = vmul.f32 %v559_v48, %v543_v22  ;;  %v283_v42 = vmul.f32 %v870_v31, %v282_v40 }
 0x120   : > { %v568_v53 = vmul.f32 %v564_v51, %v564_v51  ;;  %v569_v43 = vmul.f32 %v565_v52, %v565_v52  ;;  %v562_v54 = vsub.f32 %v491_v21, %v560_v37  ;;  %v563_v55 = vsub.f32 %v531_v25, %v560_v37 }
 0x121   : > { %v284_v50 = vadd.f32 %v870_v31, %v283_v42 }
 0x122   : > { %v579_v56 = vsel %vm534_vm4, %v568_v53, 0.0  ;;  %v580_v57 = vsel %vm534_vm4, %v569_v43, 0.0  ;;  %v566_v58 = vmul.f32 %v562_v54, %v562_v54  ;;  %v567_v59 = vmul.f32 %v563_v55, %v563_v55  ;;  %v633_v55 = vld [vmem:[%s210_s17 + $0x2] sm:$0x3] }
 0x123   : > { %v581_v60 = vadd.f32 %v580_v57, %v579_v56  ;;  %v286_v53 = vsel %vm285_vm6, %v870_v31, %v284_v50 }
 0x124   : > { %v570_v61 = vsel %vm534_vm4, %v566_v58, 0.0  ;;  %v571_v62 = vsel %vm534_vm4, %v567_v59, 0.0 }
 0x125   : > { %v582_v33 = vrot.slane %v581_v60, 4  ;;  %v572_v63 = vadd.f32 %v571_v62, %v570_v61 }
 0x127   : > { %v583_v0 = vadd.f32 %v582_v33, %v581_v60  ;;  %v573_v1 = vrot.slane %v572_v63, 4  ;;  %v632_v60 = vld [vmem:[%s210_s17] sm:$0x3]  ;;  %s895_s17 = scalar_lea.hbm %s1221_s3, 16 }
 0x128   : > { %p897_p1 = scmp.lt.s32.totalorder %s895_s17, %s891_s9 }
 0x129   : > { %v584_v4 = vrot.slane %v583_v0, 2  ;;  %v574_v5 = vadd.f32 %v573_v1, %v572_v63  ;;  %v636_v1 = vld [vmem:[%s216_s25] sm:$0x3] }
 0x12a   : > { %p898_p2 = por %p897_p1, %p896_p0 }
 0x12b   : > { %v585_v6 = vadd.f32 %v584_v4, %v583_v0  ;;  %v575_v7 = vrot.slane %v574_v5, 2 }
 0x12c   : > { %p899_p3 = pnand %p898_p2, %p894_p13 }
 0x12d   : > { %v586_v8 = vrot.slane %v585_v6, 1  ;;  %v576_v10 = vadd.f32 %v575_v7, %v574_v5 }
 0x12f   : > { %v587_v11 = vadd.f32 %v586_v8, %v585_v6  ;;  %v577_v12 = vrot.slane %v576_v10, 1  ;;  %v637_v6 = vld [vmem:[%s216_s25 + $0x2] sm:$0x3] }
 0x131   : > { %v589_v13 = vmul.f32 0.06666667, %v587_v11  ;;  %v578_v46 = vadd.f32 %v577_v12, %v576_v10  ;;  %v952_v10 = vmov 269488144  }
 0x132   : > { %v651_v11 = vunpack.c.l.s4 %v952_v10 }
 0x133   : > { %v593_v14 = vsel %vm534_vm4, %v589_v13, 0.0  ;;  %v588_v15 = vmul.f32 0.06666667, %v578_v46 }
 0x134   : > { %594 = vadd.xlane.f32.xlu2 %v593_v14 }
 0x135   : > { %v590_v16 = vsel %vm534_vm4, %v588_v15, 0.0 }
 0x136   : > { %591 = vadd.xlane.f32.xlu1 %v590_v16 }
 0x13e   : > { %275 = vadd.xlane.f32.xlu1 %v274_v19 }
 0x1a7   : > { %v595_v20 = vpop.xlane.xlu2 %594 }
 0x1a8   : > { %v597_v21 = vmul.f32 %v595_v20, %v559_v48 }
 0x1a9   : > { %v592_v23 = vpop.xlane.xlu1 %591 }
 0x1aa   : > { %v599_v9 = vsub.f32 %v589_v13, %v597_v21  ;;  %v596_v18 = vmul.f32 %v592_v23, %v559_v48  ;;  %v652_v13 = vunpack.c.0.s8 %v651_v11 }
 0x1ac   : > { %v598_v24 = vsub.f32 %v588_v15, %v596_v18  ;;  %v601_v25 = vmul.f32 %v599_v9, %v599_v9 }
 0x1ae   : > { %v605_v26 = vsel %vm534_vm4, %v601_v25, 0.0  ;;  %v600_v27 = vmul.f32 %v598_v24, %v598_v24 }
 0x1af   : > { %606 = vadd.xlane.f32.xlu2 %v605_v26 }
 0x1b0   : > { %v602_v28 = vsel %vm534_vm4, %v600_v27, 0.0 }
 0x1b1   : > { %603 = vadd.xlane.f32.xlu0 %v602_v28  ;;  %v276_v57 = vpop.xlane.xlu1 %275 }
 0x1b2   : > { %v287_v33 = vmul.f32 %v286_v53, %v276_v57 }
 0x1b7   : > { %278 = vadd.xlane.f32.xlu2 %v277_v30 }
 0x222   : > { %v607_v32 = vpop.xlane.xlu2 %606 }
 0x223   : > { %v609_v34 = vmul.f32 0.06666667, %v607_v32 }
 0x224   : > { %v604_v17 = vpop.xlane.xlu0 %603 }
 0x225   : > { %v611_v35 = vadd.f32 1e-05, %v609_v34  ;;  %v608_v36 = vmul.f32 0.06666667, %v604_v17 }
 0x227   : > { %871 = vrsqrt.f32 %v611_v35  ;;  %v610_v39 = vadd.f32 1e-05, %v608_v36  ;;  %vm628_vm8 = vweird.f32 %v611_v35 }
 0x229   : > { %873 = vrsqrt.f32 %v610_v39  ;;  %vm618_vm11 = vweird.f32 %v610_v39 }
 0x22a   : > { %v279_v56 = vpop.xlane.xlu2 %278 }
 0x22b   : > { %v288_v62 = vmul.f32 %v286_v53, %v279_v56 }
 0x22d   : > { %v872_v41 = vpop.eup %871 }
 0x22e   : > { %v623_v47 = vmul.f32 %v872_v41, %v611_v35  ;;  %vm629_vm7 = vweird.f32 %v872_v41 }
 0x22f   : > { %v874_v48 = vpop.eup %873  ;;  %vm630_vm10 = vmor %vm628_vm8, %vm629_vm7 }
 0x230   : > { %v624_v29 = vmul.f32 %v872_v41, %v623_v47  ;;  %v613_v49 = vmul.f32 %v874_v48, %v610_v39  ;;  %vm619_vm9 = vweird.f32 %v874_v48 }
 0x231   : > { %vm620_vm12 = vmor %vm618_vm11, %vm619_vm9 }
 0x232   : > { %v625_v22 = vmul.f32 0.5, %v624_v29  ;;  %v614_v51 = vmul.f32 %v874_v48, %v613_v49 }
 0x234   : > { %v626_v52 = vsub.f32 1.5, %v625_v22  ;;  %v615_v37 = vmul.f32 0.5, %v614_v51 }
 0x236   : > { %v616_v43 = vsub.f32 1.5, %v615_v37  ;;  %v627_v54 = vmul.f32 %v872_v41, %v626_v52 }
 0x238   : > { %v631_v58 = vsel %vm630_vm10, %v872_v41, %v627_v54  ;;  %v617_v59 = vmul.f32 %v874_v48, %v616_v43 }
 0x239   : > { %v635_v61 = vmul.f32 %v633_v55, %v631_v58 }
 0x23a   : > { %v621_v63 = vsel %vm620_vm12, %v874_v48, %v617_v59 }
 0x23b   : > { %v634_v0 = vmul.f32 %v632_v60, %v621_v63  ;;  %648 = vperm.xlu1 %863, %v635_v61   ;;  %v639_v4 = vmul.f32 %v635_v61, %v288_v62 }
 0x23d   : > { %v638_v5 = vmul.f32 %v634_v0, %v287_v33  ;;  %644 = vperm.xlu0 %862, %v634_v0   ;;  %v641_v8 = vsub.f32 %v637_v6, %v639_v4 }
 0x23f   : > { %v640_v7 = vsub.f32 %v636_v1, %v638_v5 }
 0x241   : > { %664 = vperm.xlu2 %864, %v640_v7  }
 0x243   : > { %668 = vperm.xlu1 %863, %v641_v8  }
 0x29b   : > { %v665_v46 = vpop.permute.xlu2 %664 }
 0x29c   : > { %v673_v16 = vperm.slane %v665_v46, %v652_v13 }
 0x2ad   : > { %v649_v12 = vpop.permute.xlu1 %648 }
 0x2ae   : > { %v657_v19 = vperm.slane %v649_v12, %v652_v13 }
 0x2af   : > { %v645_v14 = vpop.permute.xlu0 %644 }
 0x2b0   : > { %v653_v15 = vperm.slane %v645_v14, %v652_v13  ;;  %v661_v9 = vmul.f32 %v657_v19, %v1029_v2 }
 0x2b2   : > { %v660_v20 = vmul.f32 %v653_v15, %v1031_v3 }
 0x2b4   : > { %v680_v21 = vadd.f32 %v673_v16, %v660_v20 }
 0x2b5   : > { %v669_v23 = vpop.permute.xlu1 %668 }
 0x2b6   : > { %682 = vst [vmem:[%s198_s4] sm:$0xf] %v680_v21  ;;  %v677_v18 = vperm.slane %v669_v23, %v652_v13 }
 0x2b8   : > { %v681_v24 = vadd.f32 %v677_v18, %v661_v9 }
 0x2ba   : > { %683 = vst [vmem:[%s198_s4 + $0x4] sm:$0xf] %v681_v24 }
 0x2bb   : > { %902 = shalt.err (!%p899_p3)
}
 0x2bc   : > { %s953_s25 = smov 4  }
 0x2bd   : > { %808 = dma.vmem_to_hbm [thread:$0]  (%p1012_p5), %s699_s5, 128, %s701_s6, %s685_s16, %s946_s8, %s946_s8, %s953_s25  }
 0x2be PF: > { %p814_p4 = scmp.ge.s32.totalorder %s937_s15, 2  ;;  %s715_s26 = sand.u32 1, %s925_s12  }
 0x2bf   : > { %s716_s24 = scalar_lea.sflag [#allocation3], %s715_s26 }
 0x2c0   : > { %p811_p7 = pnand %p814_p4, %p1016_p6 }
 0x2c2   : > { %p812_p8 = pneg %p811_p7 }
 0x2c4   : > { %920 = dma.done.wait (%p812_p8), %s716_s24, 128  }
 0x2c5   : > { %922 = vsyncadd (%p812_p8), %s716_s24, 4294967168  ;;  %p13_p9 = scmp.ge.s32.totalorder %s999_s18, 4   ;;  %s1224_s12 = smov %s929_s13 }
 0x2c6   : > { %s1225_s13 = smov %s933_s14  ;;  %s1226_s14 = smov %s1010_s21 }
 0x2c7   : > { %s1227_s15 = smov %s999_s18  ;;  %15 = sbr.rel (!%p13_p9) target bundleno = 3 (0x3), region = 75 }
 0x2cc   :  { %722 = vsyncpa [#allocation3], 1 }
 0x2cd   :  { %724 = vsyncpa [#allocation3 + $0x1], 1 }

</bundles_post_ra>
